<compile_context>
chip_gen: v5e
topology: v5e:2x2
jax: 0.10.0
libtpu: 0.0.40
codegen_flags: <defaults>
</compile_context>

<pallas_src>
import jax
import jax.numpy as jnp
from jax.experimental import pallas as pl
from jax.experimental.pallas import tpu as pltpu

K = 3  # temporal kernel size


def timeblock_kernel(x_ref, w_ref, b_ref, o_ref):
    # x_ref: (tile, T+K-1, Cin)   w_ref: (K*Cin, 3*Cout)
    # b_ref: (1, 3*Cout)          o_ref: (tile*T, Cout)
    x = x_ref[...]
    tile, t_pad, c_in = x.shape
    t = t_pad - (K - 1)
    c_out = o_ref.shape[-1]

    # im2col slab built once: K static time-shifted slices concatenated along
    # lanes, then a leading-dim merge (layout-preserving) -> (tile*T, K*Cin).
    slab = jnp.concatenate([x[:, k:k + t, :] for k in range(K)], axis=-1)
    slab = slab.reshape(tile * t, K * c_in)

    # One fused MXU matmul for all three convolutions and all K taps; a single
    # fused (1, 3*Cout) bias add in f32.
    y = jnp.dot(slab, w_ref[...], preferred_element_type=jnp.float32)
    y = y + b_ref[...].astype(jnp.float32)

    y1 = y[:, :c_out]              # conv1
    y2 = y[:, c_out:2 * c_out]     # conv2
    y3 = y[:, 2 * c_out:]          # conv3
    out = jnp.maximum(y1 + jax.nn.sigmoid(y2) + y3, 0.0)
    o_ref[...] = out.astype(o_ref.dtype)


def _row_tile(n_rows, T, Cin, Cout):
    """Rows (= B*N) per grid step: multiple of 8, capped by a VMEM budget and
    at 256, and >=2 grid steps when possible so both v7x TensorCores get work."""
    # Rough f32 bytes of live VMEM per row: double-buffered input block,
    # im2col slab, fused matmul result, double-buffered output block.
    per_row = 4 * (2 * (T + K - 1) * Cin + T * K * Cin + T * 3 * Cout + 2 * T * Cout)
    budget = 8 * 1024 * 1024
    cap = max(8, (budget // max(per_row, 1)) // 8 * 8)

    tile = min(256, cap, max(8, ((n_rows + 7) // 8) * 8))
    if pl.cdiv(n_rows, tile) < 2 and tile >= 16:
        tile = max(8, ((tile // 2 + 7) // 8) * 8)
    return tile


def time_block(x, w1, b1, w2, b2, w3, b3):
    """x: (B, N, T, C_in) -> (B, N, T, C_out).

    Weights are stored as (K, C_in, C_out) (PyTorch (C_out, C_in, 1, K)
    transposed), biases as (1, C_out).
    """
    B, N, T, Cin = x.shape
    Cout = w1.shape[-1]
    R = B * N

    # Fuse the three conv weights/biases into one matmul operand.
    wf = jnp.concatenate([w1, w2, w3], axis=-1).reshape(K * Cin, 3 * Cout)
    bf = jnp.concatenate([b1, b2, b3], axis=-1)            # (1, 3*Cout)

    tile = _row_tile(R, T, Cin, Cout)
    r_pad = pl.cdiv(R, tile) * tile

    # Flatten (B, N) -> rows, 'same' pad along time, pad rows to a tile multiple.
    xr = x.reshape(R, T, Cin)
    xr = jnp.pad(xr, ((0, r_pad - R), (1, 1), (0, 0)))     # (r_pad, T+K-1, Cin)

    out2d = pl.pallas_call(
        timeblock_kernel,
        out_shape=jax.ShapeDtypeStruct((r_pad * T, Cout), x.dtype),
        grid_spec=pltpu.PrefetchScalarGridSpec(
            num_scalar_prefetch=0,
            grid=(r_pad // tile,),
            in_specs=[
                pl.BlockSpec((tile, T + K - 1, Cin), lambda r: (r, 0, 0)),
                # Constant index_maps -> weights / bias stay VMEM-resident.
                pl.BlockSpec((K * Cin, 3 * Cout), lambda r: (0, 0)),
                pl.BlockSpec((1, 3 * Cout), lambda r: (0, 0)),
            ],
            out_specs=pl.BlockSpec((tile * T, Cout), lambda r: (r, 0)),
        ),
        compiler_params=pltpu.CompilerParams(dimension_semantics=("parallel",)),
    )(xr, wf, bf)

    return out2d[: R * T].reshape(B, N, T, Cout)


def time_block_reference(x, w1, b1, w2, b2, w3, b3):
    """Pure-JAX reference, numerically identical semantics to the PyTorch module."""
    T = x.shape[2]
    x_pad = jnp.pad(x, ((0, 0), (0, 0), (1, 1), (0, 0)))

    def conv(w, b):
        acc = jnp.zeros(x.shape[:3] + (w.shape[-1],), jnp.float32)
        for k in range(K):
            acc = acc + jnp.einsum(
                "bntc,cd->bntd", x_pad[:, :, k:k + T, :].astype(jnp.float32), w[k]
            )
        return acc + b[0]

    c1, c2, c3 = conv(w1, b1), conv(w2, b2), conv(w3, b3)
    return jnp.maximum(c1 + jax.nn.sigmoid(c2) + c3, 0.0).astype(x.dtype)


if __name__ == "__main__":
    # Small shapes consistent with the forward: (batch, num_nodes, num_timesteps, in_channels)
    B, N, T, Cin, Cout = 2, 8, 16, 4, 8

    key = jax.random.PRNGKey(0)
    kx, k1, k2, k3, kb1, kb2, kb3 = jax.random.split(key, 7)

    x = jax.random.normal(kx, (B, N, T, Cin), dtype=jnp.float32)

    # Deterministic synthetic parameters (PyTorch Conv2d-like fan-in scaling).
    scale = 1.0 / (Cin * K) ** 0.5
    w1 = jax.random.uniform(k1, (K, Cin, Cout), jnp.float32, -scale, scale)
    w2 = jax.random.uniform(k2, (K, Cin, Cout), jnp.float32, -scale, scale)
    w3 = jax.random.uniform(k3, (K, Cin, Cout), jnp.float32, -scale, scale)
    b1 = jax.random.uniform(kb1, (1, Cout), jnp.float32, -scale, scale)
    b2 = jax.random.uniform(kb2, (1, Cout), jnp.float32, -scale, scale)
    b3 = jax.random.uniform(kb3, (1, Cout), jnp.float32, -scale, scale)

    out = jax.block_until_ready(time_block(x, w1, b1, w2, b2, w3, b3))
    ref = jax.block_until_ready(time_block_reference(x, w1, b1, w2, b2, w3, b3))

    assert out.shape == (B, N, T, Cout), out.shape
    assert jnp.allclose(out, ref, atol=1e-5, rtol=1e-5), float(jnp.max(jnp.abs(out - ref)))

    print("KERNEL_OK")
</pallas_src>

<mosaic_0001>
module attributes {stable_mosaic.version = 11 : i64} {
  func.func @timeblock_kernel(%arg0: i32, %arg1: memref<8x18x4xf32, #tpu.memory_space<vmem>>, %arg2: memref<12x24xf32, #tpu.memory_space<vmem>>, %arg3: memref<1x24xf32, #tpu.memory_space<vmem>>, %arg4: memref<128x8xf32, #tpu.memory_space<vmem>>) attributes {dimension_semantics = [#tpu.dimension_semantics<parallel>], iteration_bounds = array<i64: 2>, scalar_prefetch = 0 : i64, scratch_operands = 0 : i64, tpu.core_type = #tpu.core_type<tc>, window_params = [{transform_indices = @transform_0, window_bounds = array<i64: 8, 18, 4>}, {pipeline_mode = #tpu.pipeline_mode<synchronous>, transform_indices = @transform_1, window_bounds = array<i64: 12, 24>}, {pipeline_mode = #tpu.pipeline_mode<synchronous>, transform_indices = @transform_2, window_bounds = array<i64: 1, 24>}, {transform_indices = @transform_3, window_bounds = array<i64: 128, 8>}]} {
    %c0 = arith.constant 0 : index
    %c0_0 = arith.constant 0 : index
    %c0_1 = arith.constant 0 : index
    %0 = vector.load %arg1[%c0, %c0_0, %c0_1] : memref<8x18x4xf32, #tpu.memory_space<vmem>>, vector<8x18x4xf32>
    %1 = vector.extract_strided_slice %0 {offsets = [0, 0, 0], sizes = [8, 16, 4], strides = [1, 1, 1]} : vector<8x18x4xf32> to vector<8x16x4xf32>
    %2 = vector.extract_strided_slice %0 {offsets = [0, 1, 0], sizes = [8, 16, 4], strides = [1, 1, 1]} : vector<8x18x4xf32> to vector<8x16x4xf32>
    %3 = vector.extract_strided_slice %0 {offsets = [0, 2, 0], sizes = [8, 16, 4], strides = [1, 1, 1]} : vector<8x18x4xf32> to vector<8x16x4xf32>
    %4 = tpu.concatenate %1, %2, %3 in 2 : vector<8x16x4xf32>, vector<8x16x4xf32>, vector<8x16x4xf32> -> vector<8x16x12xf32>
    %5 = vector.shape_cast %4 : vector<8x16x12xf32> to vector<128x12xf32>
    %c0_2 = arith.constant 0 : index
    %c0_3 = arith.constant 0 : index
    %6 = vector.load %arg2[%c0_2, %c0_3] : memref<12x24xf32, #tpu.memory_space<vmem>>, vector<12x24xf32>
    %cst = arith.constant dense<0.000000e+00> : vector<128x24xf32>
    %7 = tpu.matmul %5, %6, %cst {dimension_numbers = #tpu.dot_dimension_numbers<[1], [0], [0], [1], [0, 0, 1, 1], [], []>} : vector<128x12xf32>, vector<12x24xf32>, vector<128x24xf32> -> vector<128x24xf32>
    %c0_4 = arith.constant 0 : index
    %c0_5 = arith.constant 0 : index
    %8 = vector.load %arg3[%c0_4, %c0_5] : memref<1x24xf32, #tpu.memory_space<vmem>>, vector<1x24xf32>
    %9 = vector.broadcast %8 : vector<1x24xf32> to vector<128x24xf32>
    %10 = arith.addf %7, %9 : vector<128x24xf32>
    %11 = vector.extract_strided_slice %10 {offsets = [0, 0], sizes = [128, 8], strides = [1, 1]} : vector<128x24xf32> to vector<128x8xf32>
    %12 = vector.extract_strided_slice %10 {offsets = [0, 8], sizes = [128, 8], strides = [1, 1]} : vector<128x24xf32> to vector<128x8xf32>
    %13 = vector.extract_strided_slice %10 {offsets = [0, 16], sizes = [128, 8], strides = [1, 1]} : vector<128x24xf32> to vector<128x8xf32>
    %14 = arith.negf %12 : vector<128x8xf32>
    %15 = math.exp %14 : vector<128x8xf32>
    %cst_6 = arith.constant 1.000000e+00 : f32
    %16 = vector.broadcast %cst_6 : f32 to vector<128x8xf32>
    %17 = arith.addf %16, %15 : vector<128x8xf32>
    %18 = arith.divf %16, %17 : vector<128x8xf32>
    %19 = arith.addf %11, %18 : vector<128x8xf32>
    %20 = arith.addf %19, %13 : vector<128x8xf32>
    %cst_7 = arith.constant 0.000000e+00 : f32
    %21 = vector.broadcast %cst_7 : f32 to vector<128x8xf32>
    %22 = arith.maximumf %20, %21 : vector<128x8xf32>
    %c0_8 = arith.constant 0 : index
    %c0_9 = arith.constant 0 : index
    %23 = vector.load %arg4[%c0_8, %c0_9] : memref<128x8xf32, #tpu.memory_space<vmem>>, vector<128x8xf32>
    tpu.vector_store %arg4[%c0_8, %c0_9], %22 {strides = array<i32>} : memref<128x8xf32, #tpu.memory_space<vmem>>, vector<128x8xf32>,
    return
  }
  func.func @transform_0(%arg0: i32) -> (i32, i32, i32) {
    %c0_i32 = arith.constant 0 : i32
    %c0_i32_0 = arith.constant 0 : i32
    %c0_i32_1 = arith.constant 0 : i32
    return %arg0, %c0_i32, %c0_i32_0 : i32, i32, i32
  }
  func.func @transform_1(%arg0: i32) -> (i32, i32) {
    %c0_i32 = arith.constant 0 : i32
    %c0_i32_0 = arith.constant 0 : i32
    %c0_i32_1 = arith.constant 0 : i32
    return %c0_i32, %c0_i32_0 : i32, i32
  }
  func.func @transform_2(%arg0: i32) -> (i32, i32) {
    %c0_i32 = arith.constant 0 : i32
    %c0_i32_0 = arith.constant 0 : i32
    %c0_i32_1 = arith.constant 0 : i32
    return %c0_i32, %c0_i32_0 : i32, i32
  }
  func.func @transform_3(%arg0: i32) -> (i32, i32) {
    %c0_i32 = arith.constant 0 : i32
    %c0_i32_0 = arith.constant 0 : i32
    return %arg0, %c0_i32 : i32, i32
  }
}

</mosaic_0001>

<bundles_post_ra>
// kernel: tpu_custom_call.1
= control target key start
LH: loop header
LB: loop body
LE: loop exit
PB: predicated region body
PF: predicated region fallthrough
CT: control target
= control target key end

     0   :  { %s1273_s12 = smov 0   ;;  %s2030_s0 = inlined_call_operand.vmem [shape: f32[16,18,4], index: 0, kind: input, shape index: {}]   ;;  %s2031_s1 = inlined_call_operand.vmem [shape: f32[12,24], index: 1, kind: input, shape index: {}]   ;;  %s2032_s2 = inlined_call_operand.vmem [shape: f32[1,24], index: 2, kind: input, shape index: {}]   ;;  %s2033_s3 = inlined_call_operand.vmem [shape: f32[256,8], index: 3, kind: output, shape index: {}]  }
   0x1 LB: > { %s1113_s13 = sadd.s32 4294967295, %s1247_s12   ;;  %p1117_p0 = scmp.ge.s32.totalorder %s1247_s12, 1  ;;  %s1247_s12 = sphi %s1273_s12, %s13_s12  }
   0x2   : > { %p139_p1 = scmp.lt.s32.totalorder %s1247_s12, 3 }
   0x4   : > { %p140_p2 = pnand %p1117_p0, %p139_p1 }
   0x5   : > { %s1118_s14 = sshll.u32 (!%p140_p2), %s1113_s13, 3  ;;  %s1249_s19 = smov (!%p140_p2), 8  }
   0x6   : > { %143 = sbr.rel (%p140_p2) target bundleno = 512 (0x200), region = 32  ;;  %p165_p3 = scmp.lt.s32.totalorder (!%p140_p2), %s1118_s14, 15 }
   0x7   : > { %s1250_s20 = smov (!%p140_p2), 4   ;;  %s1251_s27 = smov (!%p140_p2), 112  }
   0x8   : > { %s1252_s28 = smov (!%p140_p2), 120   ;;  %s1120_s29 = sshll.u32 (!%p140_p2), %s1113_s13, 4 }
   0x9   : > { %p172_p4 = scmp.lt.s32.totalorder (!%p140_p2), %s1120_s29, 31 }
   0xb   : > { %s2063_s14 = smov (!%p165_p3, %s1118_s14), 15  ;;  %vm314_vm0 = vcmask 1045504   ;;  %vm225_vm1 = vcmask 1046528   ;;  %vm492_vm2 = vcmask 1043456   ;;  %vm403_vm3 = vcmask 31744   ;;  %s2065_s29 = smov (!%p172_p4, %s1120_s29), 31 }
   0xc   : > { %s1163_s15 = smul.u32 24, %s2063_s14  ;;  %vm420_vm4 = vcmask 64512   ;;  %vm443_vm5 = vcmask 97280   ;;  %s1121_s30 = sshll.u32 %s2065_s29, 3 }
   0xd   : > { %s1974_s6 = scalar_lea.vmem %s2033_s3, %s1121_s30 }
   0xe   : > { %s1286_s18 = scalar_lea.vmem %s2030_s0, %s1163_s15 }
   0xf   : > { %v1289_v0 = vld [vmem:[%s1286_s18 + $0x60] sm:$0xff]  ;;  %v1292_v1 = vld [vmem:[%s1286_s18 + $0x68] sm:$0xff]  ;;  %v1299_v6 = vld [vmem:[%s1286_s18 + $0x90] sm:$0xff] }
  0x10   : > { %v335_v2 = vrot.slane %v1289_v0, 2  ;;  %v336_v3 = vrot.slane %v1292_v1, 2  ;;  %v246_v4 = vrot.slane %v1289_v0, 1  ;;  %v247_v5 = vrot.slane %v1292_v1, 1  ;;  %v1302_v7 = vld [vmem:[%s1286_s18 + $0x98] sm:$0xff]  ;;  %v1310_v11 = vld [vmem:[%s1286_s18] sm:$0xff] }
  0x11   : > { %v345_v10 = vrot.slane %v1299_v6, 2  ;;  %v346_v12 = vrot.slane %v1302_v7, 2  ;;  %v256_v13 = vrot.slane %v1299_v6, 1  ;;  %v257_v14 = vrot.slane %v1302_v7, 1  ;;  %v1316_v15 = vld [vmem:[%s1286_s18 + $0x8] sm:$0xff]  ;;  %v1324_v21 = vld [vmem:[%s1286_s18 + $0x30] sm:$0xff] }
  0x12   : > { %v337_v8 = vsel %vm314_vm0, %v335_v2, %v336_v3  ;;  %v248_v9 = vsel %vm225_vm1, %v246_v4, %v247_v5  ;;  %v226_v16 = vrot.slane %v1310_v11, 1  ;;  %v227_v17 = vrot.slane %v1316_v15, 1  ;;  %v1327_v22 = vld [vmem:[%s1286_s18 + $0x38] sm:$0xff]  ;;  %v191_v32 = vld [vmem:[%s1286_s18 + $0x70] sm:$0x3]  ;;  %v1360_v49 = vld [vmem:[%s1286_s18 + $0x80] sm:$0xff] }
  0x13   : > { %371 = vrot.lane.b32.xlu1 %v337_v8, %s1249_s19  ;;  %282 = vrot.lane.b32.xlu0 %v248_v9, %s1250_s20  ;;  %v347_v19 = vsel %vm314_vm0, %v345_v10, %v346_v12  ;;  %v258_v20 = vsel %vm225_vm1, %v256_v13, %v257_v14  ;;  %v237_v23 = vrot.slane %v1327_v22, 1  ;;  %v236_v24 = vrot.slane %v1324_v21, 1  ;;  %v197_v33 = vld [vmem:[%s1286_s18 + $0xa0] sm:$0x3]  ;;  %v179_v41 = vld [vmem:[%s1286_s18 + $0x10] sm:$0x3] }
  0x14   : > { %v228_v18 = vsel %vm225_vm1, %v226_v16, %v227_v17  ;;  %v325_v25 = vrot.slane %v1324_v21, 2  ;;  %v326_v26 = vrot.slane %v1327_v22, 2  ;;  %v315_v27 = vrot.slane %v1310_v11, 2  ;;  %v185_v40 = vld [vmem:[%s1286_s18 + $0x40] sm:$0x3]  ;;  %v1353_v43 = vld [vmem:[%s1286_s18 + $0xb0] sm:$0xff] }
  0x15   : > { %266 = vrot.lane.b32.xlu2 %v228_v18, %s1250_s20  ;;  %v316_v28 = vrot.slane %v1316_v15, 2  ;;  %v238_v29 = vsel %vm225_vm1, %v236_v24, %v237_v23  ;;  %v249_v34 = vrot.slane %v191_v32, 1  ;;  %v338_v35 = vrot.slane %v191_v32, 2  ;;  %v200_v44 = vld [vmem:[%s1286_s18 + $0xb8] sm:$0x3]  ;;  %v1375_v59 = vld [vmem:[%s1286_s18 + $0x20] sm:$0xff] }
  0x16   : > { %v327_v30 = vsel %vm314_vm0, %v325_v25, %v326_v26  ;;  %v259_v36 = vrot.slane %v197_v33, 1  ;;  %v348_v42 = vrot.slane %v197_v33, 2  ;;  %v262_v45 = vrot.slane %v1353_v43, 1  ;;  %v194_v52 = vld [vmem:[%s1286_s18 + $0x88] sm:$0x3]  ;;  %v1372_v57 = vld [vmem:[%s1286_s18 + $0x78] sm:$0xff] }
  0x17   : > { %v317_v31 = vsel %vm314_vm0, %v315_v27, %v316_v28  ;;  %v250_v37 = vsel %vm225_vm1, %v247_v5, %v249_v34  ;;  %v339_v38 = vsel %vm314_vm0, %v336_v3, %v338_v35  ;;  %v239_v46 = vrot.slane %v185_v40, 1  ;;  %v182_v61 = vld [vmem:[%s1286_s18 + $0x28] sm:$0x3]  ;;  %v1394_v16 = vld [vmem:[%s1286_s18 + $0x50] sm:$0xff]  ;;  %v188_v18 = vld [vmem:[%s1286_s18 + $0x58] sm:$0x3] }
  0x18   : > { %v260_v39 = vsel %vm225_vm1, %v257_v14, %v259_v36  ;;  %v229_v47 = vrot.slane %v179_v41, 1  ;;  %v264_v48 = vrot.slane %v200_v44, 1  ;;  %v349_v50 = vsel %vm314_vm0, %v346_v12, %v348_v42  ;;  %v1388_v10 = vld [vmem:[%s1286_s18 + $0xa8] sm:$0xff] }
  0x19   : > { %v240_v53 = vsel %vm225_vm1, %v237_v23, %v239_v46  ;;  %v252_v55 = vrot.slane %v1360_v49, 1  ;;  %v254_v56 = vrot.slane %v194_v52, 1  ;;  %v318_v58 = vrot.slane %v179_v41, 2  ;;  %v1414_v33 = vld [vmem:[%s1286_s18 + $0x48] sm:$0xff] }
  0x1a   : > { %v1364_v51 = vsel %vm225_vm1, %v262_v45, %v264_v48  ;;  %v230_v54 = vsel %vm225_vm1, %v227_v17, %v229_v47  ;;  %v232_v62 = vrot.slane %v1375_v59, 1  ;;  %v251_v63 = vrot.slane %v1372_v57, 1 }
  0x1b   : > { %379 = vrot.lane.b32.xlu1 %v347_v19, %s1249_s19  ;;  %290 = vrot.lane.b32.xlu0 %v258_v20, %s1250_s20  ;;  %v255_v60 = vsel %vm225_vm1, %v252_v55, %v254_v56  ;;  %v328_v2 = vrot.slane %v185_v40, 2  ;;  %v234_v3 = vrot.slane %v182_v61, 1  ;;  %v319_v4 = vsel %vm314_vm0, %v316_v28, %v318_v58 }
  0x1c   : > { %v253_v8 = vsel %vm225_vm1, %v251_v63, %v252_v55  ;;  %v351_v12 = vrot.slane %v1353_v43, 2  ;;  %v353_v13 = vrot.slane %v200_v44, 2  ;;  %v261_v14 = vrot.slane %v1388_v10, 1 }
  0x1d   : > { %274 = vrot.lane.b32.xlu2 %v238_v29, %s1250_s20  ;;  %v235_v5 = vsel %vm225_vm1, %v232_v62, %v234_v3  ;;  %v329_v9 = vsel %vm314_vm0, %v326_v26, %v328_v2  ;;  %v331_v19 = vrot.slane %v1394_v16, 2  ;;  %v350_v20 = vrot.slane %v1388_v10, 2 }
  0x1e   : > { %v354_v17 = vsel %vm314_vm0, %v351_v12, %v353_v13  ;;  %v340_v23 = vrot.slane %v1372_v57, 2  ;;  %v341_v24 = vrot.slane %v1360_v49, 2  ;;  %v333_v25 = vrot.slane %v188_v18, 2 }
  0x1f   : > { %v263_v26 = vsel %vm225_vm1, %v261_v14, %v262_v45  ;;  %v352_v28 = vsel %vm314_vm0, %v350_v20, %v351_v12  ;;  %v323_v32 = vrot.slane %v182_v61, 2  ;;  %v242_v36 = vrot.slane %v1394_v16, 1 }
  0x20   : > { %v334_v27 = vsel %vm314_vm0, %v331_v19, %v333_v25  ;;  %v342_v29 = vsel %vm314_vm0, %v340_v23, %v341_v24  ;;  %v241_v41 = vrot.slane %v1414_v33, 1  ;;  %v330_v48 = vrot.slane %v1414_v33, 2 }
  0x22   : > { %v243_v47 = vsel %vm225_vm1, %v241_v41, %v242_v36 }
  0x23   : > { %363 = vrot.lane.b32.xlu1 %v327_v30, %s1249_s19  ;;  %355 = vrot.lane.b32.xlu0 %v317_v31, %s1249_s19  ;;  %v1409_v30 = vld [vmem:[%s1286_s18 + $0x18] sm:$0xff]  ;;  %v321_v31 = vrot.slane %v1375_v59, 2 }
  0x24   : > { %v231_v34 = vrot.slane %v1409_v30, 1  ;;  %v320_v40 = vrot.slane %v1409_v30, 2 }
  0x25   : > { %284 = vrot.lane.b32.xlu2 %v250_v37, %s1250_s20  ;;  %v324_v35 = vsel %vm314_vm0, %v321_v31, %v323_v32  ;;  %v343_v37 = vrot.slane %v194_v52, 2  ;;  %v437_v52 = vld [vmem:[%s2031_s1] sm:$0xff] }
  0x26   : > { %v233_v42 = vsel %vm225_vm1, %v231_v34, %v232_v62  ;;  %v322_v46 = vsel %vm314_vm0, %v320_v40, %v321_v31 }
  0x27   : > { %v344_v44 = vsel %vm314_vm0, %v341_v24, %v343_v37 }
  0x2b   : > { %373 = vrot.lane.b32.xlu1 %v339_v38, %s1249_s19  ;;  %292 = vrot.lane.b32.xlu0 %v260_v39, %s1250_s20  ;;  %v244_v38 = vrot.slane %v188_v18, 1  ;;  %v438_v39 = vld [vmem:[%s2031_s1 + $0x8] sm:$0xf] }
  0x2c   : > { %1158 = vmatpush.msk.msra.mxu2 %vm492_vm2, %v438_v39  ;;  %1159 = vmatpush.msk.msra.mxu3 %vm492_vm2, %v438_v39 }
  0x2d   : > { %381 = vrot.lane.b32.xlu2 %v349_v50, %s1249_s19  ;;  %v245_v45 = vsel %vm225_vm1, %v242_v36, %v244_v38  ;;  %1122 = vmatpush.msk.msra.mxu0 %vm492_vm2, %v438_v39  ;;  %v332_v50 = vsel %vm314_vm0, %v330_v48, %v331_v19 }
  0x2e   : > { %1157 = vmatpush.msk.msra.mxu1 %vm492_vm2, %v438_v39  ;;  %1161 = vmatpush.msra.mxu2 %v437_v52 }
  0x2f   : > { %1162 = vmatpush.msra.mxu3 %v437_v52  ;;  %511 = vmatpush.msra.mxu0 %v437_v52 }
  0x30   : > { %1160 = vmatpush.msra.mxu1 %v437_v52 }
  0x33   : > { %276 = vrot.lane.b32.xlu1 %v240_v53, %s1250_s20  ;;  %268 = vrot.lane.b32.xlu0 %v230_v54, %s1250_s20 }
  0x35   : > { %357 = vrot.lane.b32.xlu2 %v319_v4, %s1249_s19 }
  0x3b   : > { %286 = vrot.lane.b32.xlu1 %v253_v8, %s1250_s20  ;;  %365 = vrot.lane.b32.xlu0 %v329_v9, %s1249_s19 }
  0x3d   : > { %294 = vrot.lane.b32.xlu2 %v263_v26, %s1250_s20 }
  0x43   : > { %383 = vrot.lane.b32.xlu1 %v352_v28, %s1249_s19  ;;  %375 = vrot.lane.b32.xlu0 %v342_v29, %s1249_s19 }
  0x45   : > { %270 = vrot.lane.b32.xlu2 %v233_v42, %s1250_s20 }
  0x4b   : > { %359 = vrot.lane.b32.xlu1 %v322_v46, %s1249_s19  ;;  %278 = vrot.lane.b32.xlu0 %v243_v47, %s1250_s20 }
  0x4d   : > { %367 = vrot.lane.b32.xlu2 %v332_v50, %s1249_s19 }
  0x53   : > { %296 = vrot.lane.b32.xlu1 %v1364_v51, %s1250_s20  ;;  %288 = vrot.lane.b32.xlu0 %v255_v60, %s1250_s20 }
  0x55   : > { %377 = vrot.lane.b32.xlu2 %v344_v44, %s1249_s19 }
  0x5b   : > { %272 = vrot.lane.b32.xlu1 %v235_v5, %s1250_s20  ;;  %385 = vrot.lane.b32.xlu0 %v354_v17, %s1249_s19 }
  0x5d   : > { %280 = vrot.lane.b32.xlu2 %v245_v45, %s1250_s20 }
  0x63   : > { %369 = vrot.lane.b32.xlu1 %v334_v27, %s1249_s19  ;;  %361 = vrot.lane.b32.xlu0 %v324_v35, %s1249_s19 }
  0x6f   : > { %v267_v51 = vpop.permute.xlu2 %266 }
  0x77   : > { %v275_v53 = vpop.permute.xlu2 %274 }
  0x78   : > { %v408_v4 = vsel %vm403_vm3, %v1324_v21, %v275_v53 }
  0x7f   : > { %v285_v60 = vpop.permute.xlu2 %284 }
  0x85   : > { %v372_v54 = vpop.permute.xlu1 %371  ;;  %v283_v55 = vpop.permute.xlu0 %282 }
  0x86   : > { %v412_v56 = vsel %vm403_vm3, %v1289_v0, %v283_v55  ;;  %v404_v0 = vsel %vm403_vm3, %v1310_v11, %v267_v51 }
  0x87   : > { %v429_v58 = vsel %vm420_vm4, %v412_v56, %v372_v54  ;;  %v382_v3 = vpop.permute.xlu2 %381 }
  0x88   : > { %1131 = vmatmul.msk.f32.vlgmr.msra.gmra.mxu2 %vm443_vm5, %v429_v58 }
  0x8d   : > { %v380_v61 = vpop.permute.xlu1 %379  ;;  %v291_v62 = vpop.permute.xlu0 %290 }
  0x8e   : > { %v416_v63 = vsel %vm403_vm3, %v1299_v6, %v291_v62  ;;  %v413_v6 = vsel %vm403_vm3, %v1292_v1, %v285_v60 }
  0x8f   : > { %v433_v2 = vsel %vm420_vm4, %v416_v63, %v380_v61  ;;  %v358_v13 = vpop.permute.xlu2 %357 }
  0x90   : > { %1135 = vmatmul.msk.f32.vlgmr.msra.gmra.mxu3 %vm443_vm5, %v433_v2 }
  0x95   : > { %v364_v5 = vpop.permute.xlu1 %363  ;;  %v356_v8 = vpop.permute.xlu0 %355 }
  0x96   : > { %v421_v9 = vsel %vm420_vm4, %v404_v0, %v356_v8  ;;  %v425_v12 = vsel %vm420_vm4, %v408_v4, %v364_v5 }
  0x97   : > { %1123 = vmatmul.msk.f32.vlgmr.msra.gmra.mxu0 %vm443_vm5, %v421_v9  ;;  %1127 = vmatmul.msk.f32.vlgmr.msra.gmra.mxu1 %vm443_vm5, %v425_v12  ;;  %v295_v1 = vpop.permute.xlu2 %294 }
  0x98   : > { %v418_v29 = vsel %vm403_vm3, %v1388_v10, %v295_v1 }
  0x9d   : > { %v374_v14 = vpop.permute.xlu1 %373  ;;  %v293_v17 = vpop.permute.xlu0 %292 }
  0x9e   : > { %v417_v21 = vsel %vm403_vm3, %v1302_v7, %v293_v17  ;;  %v430_v11 = vsel %vm420_vm4, %v413_v6, %v374_v14 }
  0x9f   : > { %1132 = vmatmul.msk.f32.gmra.mxu2 %vm443_vm5, %v430_v11  ;;  %v434_v18 = vsel %vm420_vm4, %v417_v21, %v382_v3  ;;  %v271_v28 = vpop.permute.xlu2 %270 }
  0xa0   : > { %1136 = vmatmul.msk.f32.gmra.mxu3 %vm443_vm5, %v434_v18  ;;  %v406_v36 = vsel %vm403_vm3, %v1409_v30, %v271_v28 }
  0xa5   : > { %v277_v19 = vpop.permute.xlu1 %276  ;;  %v269_v20 = vpop.permute.xlu0 %268 }
  0xa6   : > { %v405_v23 = vsel %vm403_vm3, %v1316_v15, %v269_v20  ;;  %v409_v7 = vsel %vm403_vm3, %v1327_v22, %v277_v19 }
  0xa7   : > { %v422_v24 = vsel %vm420_vm4, %v405_v23, %v358_v13  ;;  %v368_v22 = vpop.permute.xlu2 %367 }
  0xa8   : > { %1124 = vmatmul.msk.f32.gmra.mxu0 %vm443_vm5, %v422_v24 }
  0xad   : > { %v287_v25 = vpop.permute.xlu1 %286  ;;  %v366_v26 = vpop.permute.xlu0 %365 }
  0xae   : > { %v426_v27 = vsel %vm420_vm4, %v409_v7, %v366_v26  ;;  %v414_v15 = vsel %vm403_vm3, %v1372_v57, %v287_v25 }
  0xaf   : > { %1128 = vmatmul.msk.f32.gmra.mxu1 %vm443_vm5, %v426_v27  ;;  %v378_v40 = vpop.permute.xlu2 %377 }
  0xb5   : > { %v384_v31 = vpop.permute.xlu1 %383  ;;  %v376_v32 = vpop.permute.xlu0 %375 }
  0xb6   : > { %v431_v34 = vsel %vm420_vm4, %v414_v15, %v376_v32  ;;  %v435_v35 = vsel %vm420_vm4, %v418_v29, %v384_v31 }
  0xb7   : > { %1133 = vmatmul.msk.f32.gmra.mxu2 %vm443_vm5, %v431_v34  ;;  %1137 = vmatmul.msk.f32.gmra.mxu3 %vm443_vm5, %v435_v35  ;;  %v281_v48 = vpop.permute.xlu2 %280 }
  0xb8   : > { %v411_v50 = vsel %vm403_vm3, %v1394_v16, %v281_v48 }
  0xbd   : > { %v360_v37 = vpop.permute.xlu1 %359  ;;  %v279_v38 = vpop.permute.xlu0 %278 }
  0xbe   : > { %v410_v10 = vsel %vm403_vm3, %v1414_v33, %v279_v38  ;;  %v423_v57 = vsel %vm420_vm4, %v406_v36, %v360_v37 }
  0xbf   : > { %1125 = vmatmul.msk.f32.gmra.mxu0 %vm443_vm5, %v423_v57  ;;  %v427_v39 = vsel %vm420_vm4, %v410_v10, %v368_v22 }
  0xc0   : > { %1129 = vmatmul.msk.f32.gmra.mxu1 %vm443_vm5, %v427_v39 }
  0xc5   : > { %v297_v41 = vpop.permute.xlu1 %296  ;;  %v289_v42 = vpop.permute.xlu0 %288 }
  0xc6   : > { %v415_v44 = vsel %vm403_vm3, %v1360_v49, %v289_v42  ;;  %v419_v33 = vsel %vm403_vm3, %v1353_v43, %v297_v41  ;;  %v1516_v43 = vld [vmem:[%s2032_s2] ss:$0 sm:$0xff] }
  0xc7   : > { %v432_v30 = vsel %vm420_vm4, %v415_v44, %v378_v40 }
  0xc8   : > { %1134 = vmatmul.msk.f32.gmra.mxu2 %vm443_vm5, %v432_v30 }
  0xcd   : > { %v273_v45 = vpop.permute.xlu1 %272  ;;  %v386_v46 = vpop.permute.xlu0 %385 }
  0xce   : > { %v436_v47 = vsel %vm420_vm4, %v419_v33, %v386_v46  ;;  %v407_v49 = vsel %vm403_vm3, %v1375_v59, %v273_v45 }
  0xcf   : > { %1138 = vmatmul.msk.f32.gmra.mxu3 %vm443_vm5, %v436_v47 }
  0xd5   : > { %v370_v52 = vpop.permute.xlu1 %369  ;;  %v362_v51 = vpop.permute.xlu0 %361 }
  0xd6   : > { %v424_v53 = vsel %vm420_vm4, %v407_v49, %v362_v51  ;;  %v428_v54 = vsel %vm420_vm4, %v411_v50, %v370_v52 }
  0xd7   : > { %1126 = vmatmul.msk.f32.gmra.mxu0 %vm443_vm5, %v424_v53  ;;  %1130 = vmatmul.msk.f32.gmra.mxu1 %vm443_vm5, %v428_v54 }
 0x10b   : > { %v537_v55 = vpop.f32.mrf.mxu2 }
 0x10c   : > { %v1519_v16 = vadd.f32 %v1516_v43, %v537_v55 }
 0x10e   : > { %977 = vrot.lane.b32.xlu2 %v1519_v16, %s1251_s27  ;;  %v1147_v2 = vmul.f32 -1.442695, %v1519_v16 }
 0x113   : > { %v549_v62 = vpop.f32.mrf.mxu3 }
 0x114   : > { %v513_v59 = vpop.f32.mrf.mxu0  ;;  %v525_v56 = vpop.f32.mrf.mxu1  ;;  %v1535_v63 = vadd.f32 %v1516_v43, %v549_v62 }
 0x115   : > { %v1524_v58 = vadd.f32 %v1516_v43, %v513_v59  ;;  %v1527_v60 = vadd.f32 %v1516_v43, %v525_v56 }
 0x116   : > { %v1151_v0 = vmul.f32 -1.442695, %v1535_v63 }
 0x117   : > { %961 = vrot.lane.b32.xlu0 %v1524_v58, %s1251_s27  ;;  %969 = vrot.lane.b32.xlu1 %v1527_v60, %s1251_s27  ;;  %v1139_v61 = vmul.f32 -1.442695, %v1524_v58  ;;  %v1143_v6 = vmul.f32 -1.442695, %v1527_v60 }
 0x119   : > { %1177 = vpow2.f32 %v1139_v61 }
 0x11a   : > { %1179 = vpow2.f32 %v1147_v2 }
 0x11b   : > { %1181 = vpow2.f32 %v1151_v0 }
 0x11f   : > { %985 = vrot.lane.b32.xlu0 %v1535_v63, %s1251_s27  ;;  %v1178_v4 = vpop.eup %1177 }
 0x120   : > { %v1544_v9 = vadd.f32 1.0, %v1178_v4  ;;  %v1180_v13 = vpop.eup %1179 }
 0x121   : > { %v1182_v11 = vpop.eup %1181  ;;  %v1558_v18 = vadd.f32 1.0, %v1180_v13 }
 0x122   : > { %v540_v3 = vpop.f32.mrf.mxu2  ;;  %1183 = vrcp.f32 %v1544_v9  ;;  %v1568_v1 = vadd.f32 1.0, %v1182_v11  ;;  %v634_v45 = vand.u32 2147483647, %v1544_v9  ;;  %v636_v46 = vand.u32 2147483648, %v1544_v9 }
 0x123   : > { %v1542_v5 = vadd.f32 %v1516_v43, %v540_v3  ;;  %v552_v17 = vpop.f32.mrf.mxu3  ;;  %1185 = vpow2.f32 %v1143_v6  ;;  %vm630_vm7 = vweird.f32 %v1544_v9  ;;  %vm750_vm10 = vweird.f32 %v1558_v18 }
 0x124   : > { %v1566_v23 = vadd.f32 %v1516_v43, %v552_v17  ;;  %1187 = vrcp.f32 %v1558_v18  ;;  %vm635_vm9 = vcmp.eq.f32.partialorder %v634_v45, 8.507059e+37  ;;  %v637_v56 = vor.u32 1.1754944e-38, %v636_v46 }
 0x125   : > { %v516_v8 = vpop.f32.mrf.mxu0  ;;  %v1148_v20 = vmul.f32 -1.442695, %v1542_v5  ;;  %v754_v6 = vand.u32 2147483647, %v1558_v18  ;;  %vm810_vm13 = vweird.f32 %v1568_v1 }
 0x126   : > { %v1547_v12 = vadd.f32 %v1516_v43, %v516_v8  ;;  %v1152_v7 = vmul.f32 -1.442695, %v1566_v23 }
 0x127   : > { %979 = vrot.lane.b32.xlu0 %v1542_v5, %s1251_s27  ;;  %1189 = vpow2.f32 %v1148_v20  ;;  %vm755_vm0 = vcmp.eq.f32.partialorder %v754_v6, 8.507059e+37 }
 0x128   : > { %963 = vrot.lane.b32.xlu1 %v1547_v12, %s1251_s27  ;;  %v1562_v19 = vpop.eup %1183  ;;  %1191 = vrcp.f32 %v1568_v1  ;;  %v1140_v26 = vmul.f32 -1.442695, %v1547_v12 }
 0x129   : > { %v626_v24 = vmul.f32 %v1562_v19, %v1544_v9  ;;  %v1186_v25 = vpop.eup %1185  ;;  %1193 = vpow2.f32 %v1152_v7  ;;  %vm631_vm6 = vweird.f32 %v1562_v19  ;;  %v816_v7 = vand.u32 2147483648, %v1568_v1 }
 0x12a   : > { %v1577_v29 = vadd.f32 1.0, %v1186_v25  ;;  %v1579_v15 = vpop.eup %1187  ;;  %1195 = vpow2.f32 %v1140_v26  ;;  %vm632_vm8 = vmor %vm630_vm7, %vm631_vm6  ;;  %v756_v25 = vand.u32 2147483648, %v1558_v18 }
 0x12b   : > { %v627_v28 = vsub.f32 1.0, %v626_v24  ;;  %v746_v57 = vmul.f32 %v1579_v15, %v1558_v18  ;;  %vm751_vm11 = vweird.f32 %v1579_v15 }
 0x12c   : > { %v528_v14 = vpop.f32.mrf.mxu1  ;;  %vm1666_vm14 = vmor %vm750_vm10, %vm751_vm11  ;;  %vm690_vm2 = vweird.f32 %v1577_v29 }
 0x12d   : > { %v1556_v21 = vadd.f32 %v1516_v43, %v528_v14  ;;  %v1190_v31 = vpop.eup %1189  ;;  %v628_v22 = vmul.f32 %v1562_v19, %v627_v28  ;;  %v747_v50 = vsub.f32 1.0, %v746_v57  ;;  %v814_v28 = vand.u32 2147483647, %v1568_v1 }
 0x12e   : > { %v1581_v34 = vpop.eup %1191  ;;  %v1588_v37 = vadd.f32 1.0, %v1190_v31  ;;  %v694_v31 = vand.u32 2147483647, %v1577_v29 }
 0x12f   : > { %971 = vrot.lane.b32.xlu2 %v1556_v21, %s1251_s27  ;;  %v1144_v27 = vmul.f32 -1.442695, %v1556_v21  ;;  %v1194_v39 = vpop.eup %1193  ;;  %v806_v41 = vmul.f32 %v1581_v34, %v1568_v1  ;;  %v629_v44 = vadd.f32 %v1562_v19, %v628_v22  ;;  %v748_v2 = vmul.f32 %v1579_v15, %v747_v50 }
 0x130   : > { %v1196_v30 = vpop.eup %1195  ;;  %v1612_v48 = vadd.f32 1.0, %v1194_v39  ;;  %vm811_vm12 = vweird.f32 %v1581_v34  ;;  %vm815_vm1 = vcmp.eq.f32.partialorder %v814_v28, 8.507059e+37  ;;  %vm1692_vm3 = vcmp.eq.f32.partialorder %v694_v31, 8.507059e+37 }
 0x131   : > { %1197 = vpow2.f32 %v1144_v27  ;;  %v807_v53 = vsub.f32 1.0, %v806_v41  ;;  %v1623_v54 = vadd.f32 1.0, %v1196_v30  ;;  %v633_v55 = vsel %vm632_vm8, %v1562_v19, %v629_v44  ;;  %vm1674_vm15 = vmor %vm810_vm13, %vm811_vm12 }
 0x132   : > { %1199 = vrcp.f32 %v1577_v29  ;;  %v638_v4 = vsel %vm635_vm9, %v637_v56, %v633_v55  ;;  %v749_v14 = vadd.f32 %v1579_v15, %v748_v2  ;;  %v817_v30 = vor.u32 1.1754944e-38, %v816_v7 }
 0x133   : > { %1201 = vrcp.f32 %v1588_v37  ;;  %v808_v0 = vmul.f32 %v1581_v34, %v807_v53  ;;  %vm765_vm8 = vweird.f32 %v1588_v37  ;;  %vm645_vm9 = vweird.f32 %v1623_v54 }
 0x134   : > { %v753_v41 = vsel %vm1666_vm14, %v1579_v15, %v749_v14  ;;  %vm825_vm14 = vweird.f32 %v1612_v48 }
 0x135   : > { %v809_v17 = vadd.f32 %v1581_v34, %v808_v0 }
 0x137   : > { %v1198_v47 = vpop.eup %1197  ;;  %v813_v57 = vsel %vm1674_vm15, %v1581_v34, %v809_v17 }
 0x138   : > { %v1615_v49 = vpop.eup %1199  ;;  %v1626_v59 = vadd.f32 1.0, %v1198_v47  ;;  %v818_v50 = vsel %vm815_vm1, %v817_v30, %v813_v57 }
 0x139   : > { %v686_v62 = vmul.f32 %v1615_v49, %v1577_v29  ;;  %v1635_v8 = vpop.eup %1201  ;;  %vm691_vm5 = vweird.f32 %v1615_v49 }
 0x13a   : > { %v543_v32 = vpop.f32.mrf.mxu2  ;;  %v555_v42 = vpop.f32.mrf.mxu3  ;;  %v761_v19 = vmul.f32 %v1635_v8, %v1588_v37  ;;  %vm1733_vm6 = vmor %vm690_vm2, %vm691_vm5  ;;  %vm766_vm7 = vweird.f32 %v1635_v8  ;;  %vm705_vm13 = vweird.f32 %v1626_v59 }
 0x13b   : > { %v1584_v35 = vadd.f32 %v1516_v43, %v543_v32  ;;  %v1618_v52 = vadd.f32 %v1516_v43, %v555_v42  ;;  %v687_v11 = vsub.f32 1.0, %v686_v62  ;;  %v696_v32 = vand.u32 2147483648, %v1577_v29  ;;  %vm1760_vm10 = vmor %vm765_vm8, %vm766_vm7 }
 0x13c   : > { %v519_v36 = vpop.f32.mrf.mxu0  ;;  %v762_v39 = vsub.f32 1.0, %v761_v19 }
 0x13d   : > { %v1591_v38 = vadd.f32 %v1516_v43, %v519_v36  ;;  %981 = vrot.lane.b32.xlu1 %v1584_v35, %s1251_s27  ;;  %v531_v10 = vpop.f32.mrf.mxu1  ;;  %v1149_v61 = vmul.f32 -1.442695, %v1584_v35  ;;  %v1153_v3 = vmul.f32 -1.442695, %v1618_v52  ;;  %v688_v18 = vmul.f32 %v1615_v49, %v687_v11 }
 0x13e   : > { %v1598_v40 = vadd.f32 %v1516_v43, %v531_v10  ;;  %v697_v46 = vor.u32 1.1754944e-38, %v696_v32  ;;  %v763_v56 = vmul.f32 %v1635_v8, %v762_v39 }
 0x13f   : > { %965 = vrot.lane.b32.xlu2 %v1591_v38, %s1251_s27  ;;  %v1141_v51 = vmul.f32 -1.442695, %v1591_v38  ;;  %v689_v55 = vadd.f32 %v1615_v49, %v688_v18 }
 0x140   : > { %v1145_v33 = vmul.f32 -1.442695, %v1598_v40  ;;  %973 = vrot.lane.b32.xlu0 %v1598_v40, %s1251_s27  ;;  %v764_v28 = vadd.f32 %v1635_v8, %v763_v56 }
 0x142   : > { %1203 = vpow2.f32 %v1145_v33  ;;  %v757_v33 = vor.u32 1.1754944e-38, %v756_v25 }
 0x143   : > { %1205 = vrcp.f32 %v1612_v48 }
 0x144   : > { %1207 = vpow2.f32 %v1141_v51  ;;  %v1700_v51 = vsel %vm755_vm0, %v757_v33, %v753_v41  ;;  %v768_v33 = vsel %vm1760_vm10, %v1635_v8, %v764_v28 }
 0x145   : > { %1209 = vrcp.f32 %v1623_v54 }
 0x146   : > { %1211 = vrcp.f32 %v1626_v59 }
 0x147   : > { %881 = vrot.lane.b32.xlu2 %v638_v4, %s1252_s28  ;;  %1213 = vpow2.f32 %v1149_v61  ;;  %v769_v61 = vand.u32 2147483647, %v1588_v37 }
 0x148   : > { %v1204_v9 = vpop.eup %1203  ;;  %1215 = vpow2.f32 %v1153_v3  ;;  %v771_v3 = vand.u32 2147483648, %v1588_v37 }
 0x149   : > { %v1643_v13 = vadd.f32 1.0, %v1204_v9  ;;  %v1650_v20 = vpop.eup %1205  ;;  %vm1764_vm11 = vcmp.eq.f32.partialorder %v769_v61, 8.507059e+37 }
 0x14a   : > { %v1208_v26 = vpop.eup %1207  ;;  %v821_v11 = vmul.f32 %v1650_v20, %v1612_v48  ;;  %v772_v41 = vor.u32 1.1754944e-38, %v771_v3  ;;  %vm826_vm15 = vweird.f32 %v1650_v20 }
 0x14b   : > { %1217 = vrcp.f32 %v1643_v13  ;;  %v546_v24 = vpop.f32.mrf.mxu2  ;;  %v1670_v36 = vpop.eup %1209  ;;  %v1687_v44 = vadd.f32 1.0, %v1208_v26  ;;  %v693_v26 = vsel %vm1733_vm6, %v1615_v49, %v689_v55  ;;  %v651_v49 = vand.u32 2147483648, %v1623_v54  ;;  %vm1859_vm10 = vmor %vm825_vm14, %vm826_vm15 }
 0x14c   : > { %v1657_v27 = vadd.f32 %v1516_v43, %v546_v24  ;;  %v1678_v1 = vpop.eup %1211  ;;  %v641_v62 = vmul.f32 %v1670_v36, %v1623_v54  ;;  %v698_v57 = vsel %vm1692_vm3, %v697_v46, %v693_v26  ;;  %v822_v18 = vsub.f32 1.0, %v821_v11 }
 0x14d   : > { %v1214_v42 = vpop.eup %1213  ;;  %1219 = vrcp.f32 %v1687_v44  ;;  %v701_v17 = vmul.f32 %v1678_v1, %v1626_v59  ;;  %v652_v46 = vor.u32 1.1754944e-38, %v651_v49  ;;  %vm646_vm12 = vweird.f32 %v1670_v36 }
 0x14e   : > { %v1216_v45 = vpop.eup %1215  ;;  %v1150_v15 = vmul.f32 -1.442695, %v1657_v27  ;;  %v1714_v0 = vadd.f32 1.0, %v1214_v42  ;;  %v642_v31 = vsub.f32 1.0, %v641_v62  ;;  %v823_v56 = vmul.f32 %v1650_v20, %v822_v18  ;;  %vm1811_vm2 = vmor %vm645_vm9, %vm646_vm12 }
 0x14f   : > { %983 = vrot.lane.b32.xlu2 %v1657_v27, %s1251_s27  ;;  %v1716_v9 = vadd.f32 1.0, %v1216_v45  ;;  %v702_v22 = vsub.f32 1.0, %v701_v17  ;;  %v649_v45 = vand.u32 2147483647, %v1623_v54  ;;  %v773_v3 = vsel %vm1764_vm11, %v772_v41, %v768_v33 }
 0x150   : > { %1221 = vpow2.f32 %v1150_v15  ;;  %v643_v42 = vmul.f32 %v1670_v36, %v642_v31  ;;  %vm706_vm1 = vweird.f32 %v1678_v1  ;;  %v709_v17 = vand.u32 2147483647, %v1626_v59 }
 0x151   : > { %v1696_v47 = vpop.eup %1217  ;;  %v703_v15 = vmul.f32 %v1678_v1, %v702_v22  ;;  %vm720_vm3 = vweird.f32 %v1643_v13  ;;  %v824_v22 = vadd.f32 %v1650_v20, %v823_v56  ;;  %vm1839_vm6 = vmor %vm705_vm13, %vm706_vm1  ;;  %vm650_vm7 = vcmp.eq.f32.partialorder %v649_v45, 8.507059e+37 }
 0x152   : > { %v558_v53 = vpop.f32.mrf.mxu3  ;;  %v716_v4 = vmul.f32 %v1696_v47, %v1643_v13  ;;  %vm721_vm0 = vweird.f32 %v1696_v47  ;;  %v829_v41 = vand.u32 2147483647, %v1612_v48  ;;  %vm710_vm9 = vcmp.eq.f32.partialorder %v709_v17, 8.507059e+37 }
 0x153   : > { %v1709_v2 = vadd.f32 %v1516_v43, %v558_v53  ;;  %v1752_v10 = vpop.eup %1219  ;;  %v704_v25 = vadd.f32 %v1678_v1, %v703_v15  ;;  %vm1826_vm5 = vmor %vm720_vm3, %vm721_vm0  ;;  %v828_v45 = vsel %vm1859_vm10, %v1650_v20, %v824_v22  ;;  %v666_v20 = vand.u32 2147483648, %v1687_v44 }
 0x154   : > { %v522_v6 = vpop.f32.mrf.mxu0  ;;  %v534_v14 = vpop.f32.mrf.mxu1  ;;  %v717_v29 = vsub.f32 1.0, %v716_v4  ;;  %v656_v53 = vmul.f32 %v1752_v10, %v1687_v44  ;;  %v644_v4 = vadd.f32 %v1670_v36, %v643_v42  ;;  %vm661_vm11 = vweird.f32 %v1752_v10 }
 0x155   : > { %v1154_v19 = vmul.f32 -1.442695, %v1709_v2  ;;  %v1724_v24 = vadd.f32 %v1516_v43, %v522_v6  ;;  %v1727_v7 = vadd.f32 %v1516_v43, %v534_v14  ;;  %vm830_vm12 = vcmp.eq.f32.partialorder %v829_v41, 8.507059e+37 }
 0x156   : > { %v1222_v30 = vpop.eup %1221  ;;  %v718_v34 = vmul.f32 %v1696_v47, %v717_v29  ;;  %v657_v26 = vsub.f32 1.0, %v656_v53  ;;  %v648_v49 = vsel %vm1811_vm2, %v1670_v36, %v644_v4  ;;  %v664_v4 = vand.u32 2147483647, %v1687_v44 }
 0x157   : > { %1223 = vpow2.f32 %v1154_v19  ;;  %v1142_v43 = vmul.f32 -1.442695, %v1724_v24  ;;  %v1146_v32 = vmul.f32 -1.442695, %v1727_v7  ;;  %967 = vrot.lane.b32.xlu0 %v1724_v24, %s1251_s27  ;;  %905 = vrot.lane.b32.xlu2 %v818_v50, %s1252_s28  ;;  %v831_v50 = vand.u32 2147483648, %v1612_v48 }
 0x158   : > { %1225 = vrcp.f32 %v1714_v0  ;;  %975 = vrot.lane.b32.xlu1 %v1727_v7, %s1251_s27  ;;  %v1785_v61 = vadd.f32 1.0, %v1222_v30  ;;  %v719_v14 = vadd.f32 %v1696_v47, %v718_v34  ;;  %v726_v19 = vand.u32 2147483648, %v1643_v13 }
 0x159   : > { %1227 = vrcp.f32 %v1716_v9  ;;  %v658_v37 = vmul.f32 %v1752_v10, %v657_v26  ;;  %v653_v30 = vsel %vm650_vm7, %v652_v46, %v648_v49  ;;  %v832_v48 = vor.u32 1.1754944e-38, %v831_v50 }
 0x15a   : > { %1229 = vpow2.f32 %v1142_v43  ;;  %v727_v39 = vor.u32 1.1754944e-38, %v726_v19  ;;  %vm660_vm13 = vweird.f32 %v1687_v44  ;;  %vm665_vm15 = vcmp.eq.f32.partialorder %v664_v4, 8.507059e+37 }
 0x15b   : > { %1231 = vpow2.f32 %v1146_v32  ;;  %v711_v32 = vand.u32 2147483648, %v1626_v59  ;;  %v833_v17 = vsel %vm830_vm12, %v832_v48, %v828_v45  ;;  %vm1881_vm14 = vmor %vm660_vm13, %vm661_vm11  ;;  %v667_v49 = vor.u32 1.1754944e-38, %v666_v20 }
 0x15c   : > { %v784_v41 = vand.u32 2147483647, %v1714_v0 }
 0x15d   : > { %v1224_v55 = vpop.eup %1223  ;;  %v712_v59 = vor.u32 1.1754944e-38, %v711_v32 }
 0x15e   : > { %v1783_v8 = vpop.eup %1225  ;;  %v1787_v62 = vadd.f32 1.0, %v1224_v55  ;;  %v659_v55 = vadd.f32 %v1752_v10, %v658_v37  ;;  %vm785_vm12 = vcmp.eq.f32.partialorder %v784_v41, 8.507059e+37 }
 0x15f   : > { %v1792_v6 = vpop.eup %1227  ;;  %889 = vrot.lane.b32.xlu0 %v698_v57, %s1252_s28  ;;  %899 = vrot.lane.b32.xlu2 %v773_v3, %s1252_s28  ;;  %v776_v57 = vmul.f32 %v1783_v8, %v1714_v0  ;;  %vm781_vm0 = vweird.f32 %v1783_v8 }
 0x160   : > { %v1230_v11 = vpop.eup %1229  ;;  %1233 = vrcp.f32 %v1787_v62  ;;  %897 = vrot.lane.b32.xlu1 %v1700_v51, %s1252_s28  ;;  %v724_v51 = vand.u32 2147483647, %v1643_v13  ;;  %v723_v13 = vsel %vm1826_vm5, %v1696_v47, %v719_v14  ;;  %v836_v18 = vmul.f32 %v1792_v6, %v1716_v9 }
 0x161   : > { %v1232_v28 = vpop.eup %1231  ;;  %v1805_v31 = vadd.f32 1.0, %v1230_v11  ;;  %1235 = vrcp.f32 %v1785_v61  ;;  %v708_v47 = vsel %vm1839_vm6, %v1678_v1, %v704_v25  ;;  %v777_v46 = vsub.f32 1.0, %v776_v57 }
 0x162   : > { %v1819_v29 = vadd.f32 1.0, %v1232_v28  ;;  %vm725_vm8 = vcmp.eq.f32.partialorder %v724_v51, 8.507059e+37  ;;  %v713_v1 = vsel %vm710_vm9, %v712_v59, %v708_v47  ;;  %v837_v15 = vsub.f32 1.0, %v836_v18 }
 0x163   : > { %1237 = vrcp.f32 %v1805_v31  ;;  %v728_v33 = vsel %vm725_vm8, %v727_v39, %v723_v13  ;;  %v778_v19 = vmul.f32 %v1783_v8, %v777_v46  ;;  %v786_v25 = vand.u32 2147483648, %v1714_v0 }
 0x164   : > { %1239 = vrcp.f32 %v1819_v29  ;;  %v838_v26 = vmul.f32 %v1792_v6, %v837_v15  ;;  %v663_v43 = vsel %vm1881_vm14, %v1752_v10, %v659_v55  ;;  %v681_v54 = vand.u32 2147483648, %v1805_v31 }
 0x165   : > { %v679_v13 = vand.u32 2147483647, %v1805_v31  ;;  %vm841_vm2 = vweird.f32 %v1792_v6  ;;  %v668_v10 = vsel %vm665_vm15, %v667_v49, %v663_v43  ;;  %v779_v36 = vadd.f32 %v1783_v8, %v778_v19 }
 0x166   : > { %v1853_v42 = vpop.eup %1233  ;;  %v839_v57 = vadd.f32 %v1792_v6, %v838_v26  ;;  %vm675_vm3 = vweird.f32 %v1805_v31  ;;  %v682_v59 = vor.u32 1.1754944e-38, %v681_v54  ;;  %vm780_vm6 = vweird.f32 %v1714_v0 }
 0x167   : > { %883 = vrot.lane.b32.xlu0 %v653_v30, %s1252_s28  ;;  %893 = vrot.lane.b32.xlu2 %v728_v33, %s1252_s28  ;;  %v1868_v53 = vpop.eup %1235  ;;  %v851_v56 = vmul.f32 %v1853_v42, %v1787_v62  ;;  %v846_v30 = vand.u32 2147483648, %v1716_v9  ;;  %vm680_vm7 = vcmp.eq.f32.partialorder %v679_v13, 8.507059e+37  ;;  %vm1910_vm8 = vmor %vm780_vm6, %vm781_vm0  ;;  %vm840_vm9 = vweird.f32 %v1716_v9 }
 0x168   : > { %891 = vrot.lane.b32.xlu1 %v713_v1, %s1252_s28  ;;  %v791_v32 = vmul.f32 %v1868_v53, %v1785_v61  ;;  %v783_v45 = vsel %vm1910_vm8, %v1783_v8, %v779_v36  ;;  %v787_v0 = vor.u32 1.1754944e-38, %v786_v25  ;;  %vm1921_vm10 = vmor %vm840_vm9, %vm841_vm2  ;;  %vm856_vm11 = vweird.f32 %v1853_v42 }
 0x169   : > { %v1238_v3 = vpop.eup %1237  ;;  %v852_v51 = vsub.f32 1.0, %v851_v56  ;;  %v847_v55 = vor.u32 1.1754944e-38, %v846_v30  ;;  %v861_v56 = vand.u32 2147483648, %v1787_v62  ;;  %vm855_vm14 = vweird.f32 %v1787_v62 }
 0x16a   : > { %v1877_v14 = vpop.eup %1239  ;;  %v671_v50 = vmul.f32 %v1238_v3, %v1805_v31  ;;  %vm676_vm1 = vweird.f32 %v1238_v3  ;;  %v792_v37 = vsub.f32 1.0, %v791_v32  ;;  %v844_v31 = vand.u32 2147483647, %v1716_v9  ;;  %vm1937_vm15 = vmor %vm855_vm14, %vm856_vm11 }
 0x16b   : > { %v731_v28 = vmul.f32 %v1877_v14, %v1819_v29  ;;  %v853_v47 = vmul.f32 %v1853_v42, %v852_v51  ;;  %vm677_vm5 = vmor %vm675_vm3, %vm676_vm1  ;;  %v843_v9 = vsel %vm1921_vm10, %v1792_v6, %v839_v57  ;;  %v859_v4 = vand.u32 2147483647, %v1787_v62 }
 0x16c   : > { %v672_v44 = vsub.f32 1.0, %v671_v50  ;;  %v793_v8 = vmul.f32 %v1868_v53, %v792_v37  ;;  %vm845_vm13 = vcmp.eq.f32.partialorder %v844_v31, 8.507059e+37  ;;  %vm736_vm0 = vweird.f32 %v1877_v14 }
 0x16d   : > { %v732_v18 = vsub.f32 1.0, %v731_v28  ;;  %v854_v48 = vadd.f32 %v1853_v42, %v853_v47  ;;  %v848_v20 = vsel %vm845_vm13, %v847_v55, %v843_v9  ;;  %vm796_vm1 = vweird.f32 %v1868_v53 }
 0x16e   : > { %v673_v22 = vmul.f32 %v1238_v3, %v672_v44  ;;  %v794_v11 = vadd.f32 %v1868_v53, %v793_v8  ;;  %v741_v62 = vand.u32 2147483648, %v1819_v29  ;;  %v862_v19 = vor.u32 1.1754944e-38, %v861_v56 }
 0x16f   : > { %907 = vrot.lane.b32.xlu0 %v833_v17, %s1252_s28  ;;  %v733_v15 = vmul.f32 %v1877_v14, %v732_v18  ;;  %v858_v50 = vsel %vm1937_vm15, %v1853_v42, %v854_v48  ;;  %v801_v25 = vand.u32 2147483648, %v1785_v61  ;;  %vm735_vm2 = vweird.f32 %v1819_v29 }
 0x170   : > { %885 = vrot.lane.b32.xlu1 %v668_v10, %s1252_s28  ;;  %v674_v39 = vadd.f32 %v1238_v3, %v673_v22  ;;  %v739_v26 = vand.u32 2147483647, %v1819_v29  ;;  %vm860_vm3 = vcmp.eq.f32.partialorder %v859_v4, 8.507059e+37  ;;  %v799_v28 = vand.u32 2147483647, %v1785_v61  ;;  %vm737_vm6 = vmor %vm735_vm2, %vm736_vm0 }
 0x171   : > { %v734_v17 = vadd.f32 %v1877_v14, %v733_v15  ;;  %v863_v42 = vsel %vm860_vm3, %v862_v19, %v858_v50  ;;  %v742_v51 = vor.u32 1.1754944e-38, %v741_v62  ;;  %v802_v32 = vor.u32 1.1754944e-38, %v801_v25 }
 0x172   : > { %v678_v33 = vsel %vm677_vm5, %v1238_v3, %v674_v39  ;;  %v788_v3 = vsel %vm785_vm12, %v787_v0, %v783_v45  ;;  %vm795_vm5 = vweird.f32 %v1785_v61  ;;  %vm740_vm8 = vcmp.eq.f32.partialorder %v739_v26, 8.507059e+37  ;;  %v978_v61 = vpop.permute.xlu2 %977 }
 0x173   : > { %v683_v1 = vsel %vm680_vm7, %v682_v59, %v678_v33  ;;  %vm797_vm7 = vmor %vm795_vm5, %vm796_vm1  ;;  %v738_v43 = vsel %vm737_vm6, %v1877_v14, %v734_v17  ;;  %vm800_vm9 = vcmp.eq.f32.partialorder %v799_v28, 8.507059e+37 }
 0x174   : > { %887 = vrot.lane.b32.xlu2 %v683_v1, %s1252_s28  ;;  %v798_v44 = vsel %vm797_vm7, %v1868_v53, %v794_v11  ;;  %v743_v29 = vsel %vm740_vm8, %v742_v51, %v738_v43 }
 0x175   : > { %v803_v49 = vsel %vm800_vm9, %v802_v32, %v798_v44 }
 0x177   : > { %901 = vrot.lane.b32.xlu0 %v788_v3, %s1252_s28 }
 0x178   : > { %909 = vrot.lane.b32.xlu1 %v848_v20, %s1252_s28 }
 0x17c   : > { %911 = vrot.lane.b32.xlu2 %v863_v42, %s1252_s28 }
 0x17f   : > { %895 = vrot.lane.b32.xlu0 %v743_v29, %s1252_s28 }
 0x180   : > { %903 = vrot.lane.b32.xlu1 %v803_v49, %s1252_s28 }
 0x184   : > { %989 = vrot.lane.b32.xlu2 %v1618_v52, %s1251_s27 }
 0x187   : > { %991 = vrot.lane.b32.xlu0 %v1709_v2, %s1251_s27 }
 0x188   : > { %987 = vrot.lane.b32.xlu1 %v1566_v23, %s1251_s27 }
 0x189   : > { %v972_v53 = vpop.permute.xlu2 %971  ;;  %v962_v13 = vpop.permute.xlu0 %961 }
 0x18a   : > { %v970_v47 = vpop.permute.xlu1 %969 }
 0x191   : > { %v986_v18 = vpop.permute.xlu0 %985 }
 0x199   : > { %v1968_v14 = vpop.permute.xlu2 %965  ;;  %v980_v41 = vpop.permute.xlu0 %979 }
 0x19a   : > { %v964_v33 = vpop.permute.xlu1 %963 }
 0x1a1   : > { %v882_v54 = vpop.permute.xlu2 %881 }
 0x1a2   : > { %v929_v22 = vadd.f32 %v882_v54, %v1524_v58 }
 0x1a4   : > { %v1009_v10 = vadd.f32 %v962_v13, %v929_v22 }
 0x1a6   : > { %v1025_v36 = vmax.f32 %v1009_v10, 0.0 }
 0x1a8   : > { %1041 = vst.msk [vmem:[%s1974_s6] sm:$0xff] %vm420_vm4, %v1025_v36 }
 0x1a9   : > { %v1978_v57 = vpop.permute.xlu2 %983 }
 0x1af   : > { %v982_v46 = vpop.permute.xlu1 %981 }
 0x1b1   : > { %v906_v39 = vpop.permute.xlu2 %905 }
 0x1b2   : > { %v941_v58 = vadd.f32 %v906_v39, %v1535_v63  ;;  %v974_v45 = vpop.permute.xlu0 %973 }
 0x1b4   : > { %v1021_v37 = vadd.f32 %v986_v18, %v941_v58 }
 0x1b6   : > { %v1037_v59 = vmax.f32 %v1021_v37, 0.0 }
 0x1b8   : > { %1053 = vst.msk [vmem:[%s1974_s6 + $0x60] sm:$0xff] %vm420_vm4, %v1037_v59 }
 0x1b9   : > { %v900_v30 = vpop.permute.xlu2 %899 }
 0x1ba   : > { %v938_v34 = vadd.f32 %v900_v30, %v1542_v5 }
 0x1bc   : > { %v1018_v31 = vadd.f32 %v980_v41, %v938_v34 }
 0x1be   : > { %v1034_v1 = vmax.f32 %v1018_v31, 0.0 }
 0x1c0   : > { %1050 = vst.msk [vmem:[%s1974_s6 + $0x48] sm:$0xff] %vm420_vm4, %v1034_v1 }
 0x1c1   : > { %v894_v0 = vpop.permute.xlu2 %893 }
 0x1c2   : > { %v935_v63 = vadd.f32 %v894_v0, %v1598_v40 }
 0x1c4   : > { %v1015_v15 = vadd.f32 %v974_v45, %v935_v63 }
 0x1c6   : > { %v1031_v9 = vmax.f32 %v1015_v15, 0.0 }
 0x1c8   : > { %1047 = vst.msk [vmem:[%s1974_s6 + $0x30] sm:$0xff] %vm420_vm4, %v1031_v9 }
 0x1c9   : > { %v968_v48 = vpop.permute.xlu0 %967 }
 0x1ca   : > { %v976_v8 = vpop.permute.xlu1 %975 }
 0x1ce   : > { %v888_v55 = vpop.permute.xlu2 %887 }
 0x1cf   : > { %v932_v5 = vadd.f32 %v888_v55, %v1724_v24 }
 0x1d1   : > { %v1012_v56 = vadd.f32 %v968_v48, %v932_v5  ;;  %v890_v3 = vpop.permute.xlu0 %889 }
 0x1d2   : > { %v933_v4 = vadd.f32 %v890_v3, %v1527_v60  ;;  %v898_v20 = vpop.permute.xlu1 %897 }
 0x1d3   : > { %v1028_v6 = vmax.f32 %v1012_v56, 0.0  ;;  %v937_v17 = vadd.f32 %v898_v20, %v1519_v16 }
 0x1d4   : > { %v1013_v40 = vadd.f32 %v970_v47, %v933_v4 }
 0x1d5   : > { %1044 = vst.msk [vmem:[%s1974_s6 + $0x18] sm:$0xff] %vm420_vm4, %v1028_v6  ;;  %v1017_v50 = vadd.f32 %v978_v61, %v937_v17 }
 0x1d6   : > { %v1029_v11 = vmax.f32 %v1013_v40, 0.0  ;;  %v912_v44 = vpop.permute.xlu2 %911 }
 0x1d7   : > { %v1033_v62 = vmax.f32 %v1017_v50, 0.0  ;;  %v944_v37 = vadd.f32 %v912_v44, %v1709_v2 }
 0x1d8   : > { %1045 = vst.msk [vmem:[%s1974_s6 + $0x20] sm:$0xff] %vm420_vm4, %v1029_v11 }
 0x1d9   : > { %1049 = vst.msk [vmem:[%s1974_s6 + $0x40] sm:$0xff] %vm420_vm4, %v1033_v62  ;;  %v884_v24 = vpop.permute.xlu0 %883 }
 0x1da   : > { %v930_v60 = vadd.f32 %v884_v24, %v1547_v12  ;;  %v892_v19 = vpop.permute.xlu1 %891 }
 0x1db   : > { %v934_v25 = vadd.f32 %v892_v19, %v1556_v21 }
 0x1dc   : > { %v1010_v16 = vadd.f32 %v964_v33, %v930_v60 }
 0x1dd   : > { %v1014_v26 = vadd.f32 %v972_v53, %v934_v25 }
 0x1de   : > { %v1026_v28 = vmax.f32 %v1010_v16, 0.0  ;;  %v990_v54 = vpop.permute.xlu2 %989 }
 0x1df   : > { %v1030_v42 = vmax.f32 %v1014_v26, 0.0 }
 0x1e0   : > { %1042 = vst.msk [vmem:[%s1974_s6 + $0x8] sm:$0xff] %vm420_vm4, %v1026_v28 }
 0x1e1   : > { %1046 = vst.msk [vmem:[%s1974_s6 + $0x28] sm:$0xff] %vm420_vm4, %v1030_v42  ;;  %v908_v43 = vpop.permute.xlu0 %907 }
 0x1e2   : > { %v886_v51 = vpop.permute.xlu1 %885  ;;  %v942_v59 = vadd.f32 %v908_v43, %v1566_v23 }
 0x1e3   : > { %v931_v32 = vadd.f32 %v886_v51, %v1591_v38 }
 0x1e5   : > { %v1011_v12 = vadd.f32 %v1968_v14, %v931_v32 }
 0x1e7   : > { %v1027_v29 = vmax.f32 %v1011_v12, 0.0 }
 0x1e9   : > { %1043 = vst.msk [vmem:[%s1974_s6 + $0x10] sm:$0xff] %vm420_vm4, %v1027_v29  ;;  %v902_v21 = vpop.permute.xlu0 %901 }
 0x1ea   : > { %v939_v49 = vadd.f32 %v902_v21, %v1584_v35  ;;  %v910_v61 = vpop.permute.xlu1 %909 }
 0x1eb   : > { %v943_v53 = vadd.f32 %v910_v61, %v1618_v52 }
 0x1ec   : > { %v1019_v22 = vadd.f32 %v982_v46, %v939_v49 }
 0x1ed   : > { %v1023_v13 = vadd.f32 %v990_v54, %v943_v53 }
 0x1ee   : > { %v1035_v10 = vmax.f32 %v1019_v22, 0.0 }
 0x1ef   : > { %v1039_v36 = vmax.f32 %v1023_v13, 0.0 }
 0x1f0   : > { %1051 = vst.msk [vmem:[%s1974_s6 + $0x50] sm:$0xff] %vm420_vm4, %v1035_v10 }
 0x1f1   : > { %1055 = vst.msk [vmem:[%s1974_s6 + $0x70] sm:$0xff] %vm420_vm4, %v1039_v36  ;;  %v896_v38 = vpop.permute.xlu0 %895 }
 0x1f2   : > { %v904_v14 = vpop.permute.xlu1 %903  ;;  %v936_v18 = vadd.f32 %v896_v38, %v1727_v7 }
 0x1f3   : > { %v940_v35 = vadd.f32 %v904_v14, %v1657_v27 }
 0x1f4   : > { %v1016_v52 = vadd.f32 %v976_v8, %v936_v18 }
 0x1f5   : > { %v1020_v39 = vadd.f32 %v1978_v57, %v940_v35 }
 0x1f6   : > { %v1032_v47 = vmax.f32 %v1016_v52, 0.0 }
 0x1f7   : > { %v1036_v58 = vmax.f32 %v1020_v39, 0.0 }
 0x1f8   : > { %1048 = vst.msk [vmem:[%s1974_s6 + $0x38] sm:$0xff] %vm420_vm4, %v1032_v47 }
 0x1f9   : > { %1052 = vst.msk [vmem:[%s1974_s6 + $0x58] sm:$0xff] %vm420_vm4, %v1036_v58  ;;  %v992_v41 = vpop.permute.xlu0 %991 }
 0x1fa   : > { %v988_v30 = vpop.permute.xlu1 %987  ;;  %v1024_v7 = vadd.f32 %v992_v41, %v944_v37 }
 0x1fb   : > { %v1022_v33 = vadd.f32 %v988_v30, %v942_v59 }
 0x1fc   : > { %v1040_v34 = vmax.f32 %v1024_v7, 0.0 }
 0x1fd   : > { %v1038_v27 = vmax.f32 %v1022_v33, 0.0 }
 0x1fe   : > { %1056 = vst.msk [vmem:[%s1974_s6 + $0x78] sm:$0xff] %vm420_vm4, %v1040_v34 }
 0x1ff   : > { %1054 = vst.msk [vmem:[%s1974_s6 + $0x68] sm:$0xff] %vm420_vm4, %v1038_v27 }
 0x200 PF: > { %s13_s12 = sadd.s32 1, %s1247_s12  }
 0x201   : > { %p10_p5 = scmp.ge.s32.totalorder %s13_s12, 4  }
 0x203   :  { %12 = sbr.rel (!%p10_p5) target bundleno = 1 (0x1), region = 62 }

</bundles_post_ra>
